<compile_context>
chip_gen: v6e
topology: v6e:2x2x1
jax: 0.10.0
libtpu: 0.0.40
codegen_flags: <defaults>
</compile_context>

<pallas_src>
import jax
import jax.numpy as jnp
from jax.experimental import pallas as pl
from jax.experimental.pallas import tpu as pltpu

_SMALL_BYTES = 1 << 20   # below this, a single DMA is already optimal
_MAX_CHUNKS = 8          # concurrent DMA descriptors for large tensors


def _identity_single_dma_kernel(x_hbm_ref, o_hbm_ref, copy_sem):
    # One whole-array HBM -> HBM copy: start the DMA, wait for completion.
    cp = pltpu.make_async_copy(x_hbm_ref, o_hbm_ref, copy_sem)
    cp.start()
    cp.wait()


def _make_chunked_dma_kernel(bounds):
    """Kernel issuing len(bounds) concurrent HBM->HBM DMAs over static
    leading-dim slices [lo, hi); start-all then wait-all (every started DMA is
    waited on before the body returns)."""

    def kernel(x_hbm_ref, o_hbm_ref, copy_sems):
        copies = []
        for i, (lo, hi) in enumerate(bounds):
            cp = pltpu.make_async_copy(
                x_hbm_ref.at[lo:hi], o_hbm_ref.at[lo:hi], copy_sems.at[i]
            )
            cp.start()
            copies.append(cp)
        for cp in copies:
            cp.wait()

    return kernel


def identity_forward(x, *, num_chunks=_MAX_CHUNKS, small_bytes=_SMALL_BYTES):
    """Pallas identity: returns a fresh array equal to x (same shape/dtype)."""
    nbytes = x.size * x.dtype.itemsize
    cost = pl.CostEstimate(flops=0, transcendentals=0, bytes_accessed=2 * nbytes)

    common = dict(
        out_shape=jax.ShapeDtypeStruct(x.shape, x.dtype),
        in_specs=[pl.BlockSpec(memory_space=pl.ANY)],   # raw HBM ref, no auto-DMA
        out_specs=pl.BlockSpec(memory_space=pl.ANY),    # raw HBM ref, written by DMA
        cost_estimate=cost,
    )

    # Small-array fast path (or shapes that cannot be chunked): single DMA.
    if nbytes <= small_bytes or x.ndim == 0 or x.shape[0] < 2:
        return pl.pallas_call(
            _identity_single_dma_kernel,
            scratch_shapes=[pltpu.SemaphoreType.DMA(())],
            **common,
        )(x)

    # Large-array path: K concurrent DMAs along the leading dim.
    lead = x.shape[0]
    k = min(num_chunks, lead)
    base, rem = divmod(lead, k)
    bounds = []
    start = 0
    for i in range(k):
        size = base + (1 if i < rem else 0)
        bounds.append((start, start + size))
        start += size
    assert start == lead  # chunking covers the array exactly

    return pl.pallas_call(
        _make_chunked_dma_kernel(tuple(bounds)),
        scratch_shapes=[pltpu.SemaphoreType.DMA((k,))],
        **common,
    )(x)


if __name__ == "__main__":
    key = jax.random.PRNGKey(0)

    # Small NCHW input consistent with a typical conv-net tensor
    # (exercises the single-DMA fast path).
    x = jax.random.normal(key, (2, 4, 16, 16), dtype=jnp.float32)
    y = identity_forward(x)
    jax.block_until_ready(y)
    assert y.shape == x.shape and y.dtype == x.dtype
    assert bool(jnp.all(y == x))

    # Exercise the chunked multi-DMA path (forced via small_bytes=0) on a
    # ragged, non-128-aligned bf16 shape: no padding or reshaping needed.
    x2 = jax.random.normal(jax.random.PRNGKey(1), (3, 5, 17), dtype=jnp.bfloat16)
    y2 = identity_forward(x2, small_bytes=0)
    jax.block_until_ready(y2)
    assert y2.shape == x2.shape and y2.dtype == x2.dtype
    assert bool(jnp.all(y2 == x2))

    print("KERNEL_OK")
</pallas_src>

<mosaic_0001>
module attributes {stable_mosaic.version = 11 : i64} {
  func.func @_identity_single_dma_kernel(%arg0: memref<2x4x16x16xf32, #tpu.memory_space<any>>, %arg1: memref<2x4x16x16xf32, #tpu.memory_space<any>>, %arg2: memref<!tpu.dma_semaphore, #tpu.memory_space<semaphore_mem>>) attributes {dimension_semantics = [], scalar_prefetch = 0 : i64, scratch_operands = 1 : i64, tpu.core_type = #tpu.core_type<tc>} {
    tpu.enqueue_dma source(%arg0 : memref<2x4x16x16xf32, #tpu.memory_space<any>>) target(%arg1 : memref<2x4x16x16xf32, #tpu.memory_space<any>>) target_semaphore(%arg2 : memref<!tpu.dma_semaphore, #tpu.memory_space<semaphore_mem>>)
    tpu.wait_dma2 semaphore(%arg2 : memref<!tpu.dma_semaphore, #tpu.memory_space<semaphore_mem>>) src(%arg0 : memref<2x4x16x16xf32, #tpu.memory_space<any>>) dst(%arg1 : memref<2x4x16x16xf32, #tpu.memory_space<any>>)
    return
  }
}

</mosaic_0001>

<bundles_post_ra>
// kernel: tpu_custom_call.1
= control target key start
LH: loop header
LB: loop body
LE: loop exit
PB: predicated region body
PF: predicated region fallthrough
CT: control target
= control target key end

     0   :  { %s30_s6 = smov [#allocation2]   ;;  %s31_s7 = smov 131072   ;;  %s49_s0 = inlined_call_operand.hbm [shape: f32[2,4,16,16], index: 0, kind: input, shape index: {}]   ;;  %s50_s1 = inlined_call_operand.hbm [shape: f32[2,4,16,16], index: 1, kind: output, shape index: {}]  }
   0x1   :  { %s32_s8 = smov 0  }
   0x2   :  { %12 = dma.general %s49_s0, 2048, %s50_s1, %s30_s6, %s31_s7, [#allocation4], %s32_s8, 0  }
   0x3   :  { %28 = dma.done.wait [#allocation2], 2048 }
   0x4   :  { %29 = vsyncadd [#allocation2], 4294965248 }
   0x5   :  { %18 = vsyncmov [#allocation2] }
   0x8   :  { %s19_s13 = vpop.sfrf %18 }
   0x9   :  { %p24_p0 = scmp.ne.s32.totalorder %s19_s13, 0 }
   0xb   :  { %23 = shalt.err (%p24_p0)  }

</bundles_post_ra>
